<compile_context>
chip_gen: v6e
topology: v6e:2x2x1
jax: 0.10.0
libtpu: 0.0.40
codegen_flags: <defaults>
</compile_context>

<pallas_src>
import functools
import math
import numbers

import jax
import jax.numpy as jnp
from jax.experimental import pallas as pl
from jax.experimental.pallas import tpu as pltpu


# ---------------------------------------------------------------------------
# Glue helpers mirroring the PyTorch module
# ---------------------------------------------------------------------------
def apply_all(x, func):
    if isinstance(x, (list, tuple)):
        return [func(t) for t in x]
    return func(x)


def param_to_tuple(param, name, center=1.0, bounds=(0.0, float("inf"))):
    if isinstance(param, (list, tuple)):
        if len(param) != 2:
            raise ValueError(f"{name} must have two bounds")
        return (max(bounds[0], param[0]), min(bounds[1], param[1]))
    if not isinstance(param, numbers.Number):
        raise ValueError(f"{name} must be a number or a pair")
    if param == 0:
        return None
    minval = max(center - param, bounds[0])
    maxval = min(center + param, bounds[1])
    return (minval, maxval)


def to_tuple(sz, dim, name):
    if isinstance(sz, numbers.Number):
        return (sz,) * dim
    if isinstance(sz, tuple):
        if len(sz) == 1:
            return sz * dim
        elif len(sz) == dim:
            return sz
    raise ValueError(f"Expected a number of {dim}-tuple for {name}")


def _gaussian_kernel1d(ksize, sigma):
    # torchvision: x = linspace(-half, half, ksize); pdf = exp(-0.5*(x/sigma)^2)
    half = (ksize - 1) * 0.5
    pdf = [math.exp(-0.5 * ((t - half) / sigma) ** 2) for t in range(ksize)]
    s = sum(pdf)
    return tuple(p / s for p in pdf)


# ---------------------------------------------------------------------------
# Pallas kernel: fused reflect-pad + separable blur for one (cc, H, W) block
# ---------------------------------------------------------------------------
def _reflect_pad_value(x, r, axis):
    """Reflect-pad (no edge repeat, torchvision style) by r along `axis`.

    Built as a value (concatenate of reversed edge slices + the block), so no
    masked scratch stores and no full-block store/reload round trip.
    """
    if r == 0:
        return x
    n = x.shape[axis]

    def col(i):
        idx = [slice(None)] * x.ndim
        idx[axis] = slice(i, i + 1)
        return x[tuple(idx)]

    # padded[p]          = x[r - p]      for p in [0, r)
    # padded[r + n + t]  = x[n - 2 - t]  for t in [0, r)
    left = [col(r - p) for p in range(r)]
    right = [col(n - 2 - t) for t in range(r)]
    return jnp.concatenate(left + [x] + right, axis=axis)


def _gaussian_blur_kernel(x_ref, o_ref, *, wx, wy, rx, ry, compute_dtype):
    # x_ref / o_ref : (cc, H, W) channel-group block (channels independent).
    _, H, W = x_ref.shape
    x = x_ref[...].astype(compute_dtype)

    # ---- horizontal pass (lane axis); symmetric kernel => conv == corr -----
    xp = _reflect_pad_value(x, rx, axis=2)          # (cc, H, W + 2*rx)
    acc = wx[0] * xp[:, :, 0:W]
    for t in range(1, len(wx)):
        acc = acc + wx[t] * xp[:, :, t:t + W]

    # ---- vertical pass (sublane axis) ---------------------------------------
    ap = _reflect_pad_value(acc, ry, axis=1)        # (cc, H + 2*ry, W)
    out = wy[0] * ap[:, 0:H, :]
    for t in range(1, len(wy)):
        out = out + wy[t] * ap[:, t:t + H, :]

    out_dtype = o_ref.dtype
    if jnp.issubdtype(out_dtype, jnp.integer):
        info = jnp.iinfo(out_dtype)
        out = jnp.clip(jnp.round(out), info.min, info.max)
    o_ref[...] = out.astype(out_dtype)


# ---------------------------------------------------------------------------
# Wrapper
# ---------------------------------------------------------------------------
def _pick_compute_dtype(img_dtype):
    # bf16 VPU packing on v6e/v7x roughly doubles elementwise throughput and
    # halves VMEM; v5e and older have no bf16 VPU -> keep f32 there.
    if img_dtype == jnp.bfloat16:
        try:
            kind = jax.devices()[0].device_kind.lower()
        except Exception:  # pragma: no cover - defensive
            kind = ""
        if ("v6" in kind) or ("v7" in kind) or ("7x" in kind):
            return jnp.bfloat16
    return jnp.float32


def _channels_per_block(nc, H, W, compute_itemsize):
    # ~2 MiB per block (in compute dtype): big enough to sit near the HBM
    # roofline and amortize the ~0.35 us per-grid-step overhead, small enough
    # that double-buffered in/out + intermediates stay far below 48 MiB.
    budget = 2 << 20
    per_ch = max(1, H * W * int(compute_itemsize))
    cc = max(1, min(nc, budget // per_ch))
    # Prefer >= 2 grid steps when possible so both v7x TensorCores get work.
    if nc > 1 and cc >= nc:
        cc = (nc + 1) // 2
    return int(cc)


def gaussian_blur_pallas(img, kernel_size, sigma):
    """Depthwise separable Gaussian blur with reflect padding for NCHW images.

    kernel_size = (kx, ky), sigma = (sigma_x, sigma_y); all static.
    """
    if img.ndim != 4:
        raise ValueError(f"Expected NCHW input, got shape {img.shape}")
    N, C, H, W = img.shape
    kx, ky = int(kernel_size[0]), int(kernel_size[1])
    if kx < 1 or ky < 1 or kx % 2 == 0 or ky % 2 == 0:
        raise ValueError("kernel_size must be positive and odd")
    rx, ry = kx // 2, ky // 2
    if rx >= W or ry >= H:
        raise ValueError("Gaussian kernel too large for reflect padding of this image")

    wx = _gaussian_kernel1d(kx, float(sigma[0]))
    wy = _gaussian_kernel1d(ky, float(sigma[1]))

    compute_dtype = _pick_compute_dtype(img.dtype)
    nc = N * C
    x2 = img.reshape(nc, H, W)  # flatten N*C: depthwise => channels independent
    cc = _channels_per_block(nc, H, W, jnp.dtype(compute_dtype).itemsize)
    grid = (pl.cdiv(nc, cc),)

    kernel = functools.partial(
        _gaussian_blur_kernel, wx=wx, wy=wy, rx=rx, ry=ry,
        compute_dtype=compute_dtype)

    out = pl.pallas_call(
        kernel,
        out_shape=jax.ShapeDtypeStruct((nc, H, W), img.dtype),
        grid=grid,
        in_specs=[pl.BlockSpec((cc, H, W), lambda g: (g, 0, 0))],
        out_specs=pl.BlockSpec((cc, H, W), lambda g: (g, 0, 0)),
        compiler_params=pltpu.CompilerParams(
            dimension_semantics=("parallel",),
            vmem_limit_bytes=48 * 1024 * 1024,
        ),
    )(x2)
    return out.reshape(N, C, H, W)


# ---------------------------------------------------------------------------
# GaussianBlur module (JAX / Pallas port)
# ---------------------------------------------------------------------------
class GaussianBlurPallas:
    """Random-sigma Gaussian blur transform (NCHW tensors, reflect padding)."""

    def __init__(self, kernel_size=None, sigma=(0.1, 2.0), isotropic=False):
        self.kernel_size = (
            None if kernel_size is None
            else to_tuple(kernel_size, 2, "GaussianBlur.kernel_size")
        )
        self.sigma = param_to_tuple(sigma, "GaussianBlur.sigma")
        self.isotropic = isotropic
        self.last_params = None  # (kernel_size, sigma) used by the last call

    def __call__(self, x, key):
        # Host-side random sigma draw (replaces torch.empty(1).uniform_).
        kx_key, ky_key = jax.random.split(key)
        sigma_x = float(jax.random.uniform(
            kx_key, (), minval=self.sigma[0], maxval=self.sigma[1]))
        if self.isotropic:
            sigma_y = sigma_x
        else:
            sigma_y = float(jax.random.uniform(
                ky_key, (), minval=self.sigma[0], maxval=self.sigma[1]))
        sigma = (sigma_x, sigma_y)

        if self.kernel_size is not None:
            kernel_size = self.kernel_size
        else:
            k_x = max(2 * int(math.ceil(3 * sigma_x)) + 1, 3)
            k_y = max(2 * int(math.ceil(3 * sigma_y)) + 1, 3)
            kernel_size = (k_x, k_y)

        self.last_params = (kernel_size, sigma)  # exposed for reproducible checks
        return apply_all(x, lambda y: gaussian_blur_pallas(y, kernel_size, sigma))


# ---------------------------------------------------------------------------
# Plain-JAX reference (matches torchvision F.gaussian_blur semantics)
# ---------------------------------------------------------------------------
def reference_gaussian_blur(img, kernel_size, sigma):
    kx, ky = int(kernel_size[0]), int(kernel_size[1])
    rx, ry = kx // 2, ky // 2
    wx = _gaussian_kernel1d(kx, float(sigma[0]))
    wy = _gaussian_kernel1d(ky, float(sigma[1]))
    N, C, H, W = img.shape
    xp = jnp.pad(img.astype(jnp.float32),
                 ((0, 0), (0, 0), (ry, ry), (rx, rx)), mode="reflect")
    tmp = sum(wx[t] * xp[:, :, :, t:t + W] for t in range(kx))
    out = sum(wy[t] * tmp[:, :, t:t + H, :] for t in range(ky))
    return out.astype(img.dtype)


# ---------------------------------------------------------------------------
# Demo / self-check
# ---------------------------------------------------------------------------
if __name__ == "__main__":
    root = jax.random.PRNGKey(0)
    k_img, k_blur1, k_blur2, k_blur3 = jax.random.split(root, 4)

    x = jax.random.normal(k_img, (2, 4, 16, 16), dtype=jnp.float32)

    # Anisotropic, kernel size derived from the random sigma.
    blur = GaussianBlurPallas(sigma=(0.1, 2.0), isotropic=False)
    out = blur(x, k_blur1)
    out = jax.block_until_ready(out)
    assert out.shape == x.shape, out.shape
    ks, sg = blur.last_params
    ref = reference_gaussian_blur(x, ks, sg)
    err = float(jnp.max(jnp.abs(out - ref)))
    assert err < 1e-5, f"anisotropic blur mismatch: max abs err {err}"

    # Isotropic, fixed kernel size, list input with two resolutions.
    blur_iso = GaussianBlurPallas(kernel_size=5, sigma=(0.5, 1.5), isotropic=True)
    x_small = x[:, :, :8, :8]
    outs = blur_iso([x, x_small], k_blur2)
    outs = jax.block_until_ready(outs)
    ks2, sg2 = blur_iso.last_params
    assert sg2[0] == sg2[1]
    for o, inp in zip(outs, [x, x_small]):
        r = reference_gaussian_blur(inp, ks2, sg2)
        e = float(jnp.max(jnp.abs(o - r)))
        assert e < 1e-5, f"isotropic blur mismatch: max abs err {e}"

    # bf16 input: on v6e/v7x the kernel computes in bf16, on v5e in f32.
    xb = x.astype(jnp.bfloat16)
    blur_b = GaussianBlurPallas(kernel_size=5, sigma=(0.5, 1.5), isotropic=True)
    ob = blur_b(xb, k_blur3)
    ob = jax.block_until_ready(ob)
    ksb, sgb = blur_b.last_params
    rb = reference_gaussian_blur(xb, ksb, sgb)
    eb = float(jnp.max(jnp.abs(ob.astype(jnp.float32) - rb.astype(jnp.float32))))
    assert eb < 0.15, f"bf16 blur mismatch: max abs err {eb}"

    print("KERNEL_OK")
</pallas_src>

<mosaic_0001>
module attributes {stable_mosaic.version = 11 : i64} {
  func.func @_gaussian_blur_kernel(%arg0: i32, %arg1: memref<4x16x16xf32, #tpu.memory_space<vmem>>, %arg2: memref<4x16x16xf32, #tpu.memory_space<vmem>>) attributes {dimension_semantics = [#tpu.dimension_semantics<parallel>], iteration_bounds = array<i64: 2>, scalar_prefetch = 0 : i64, scratch_operands = 0 : i64, tpu.core_type = #tpu.core_type<tc>, window_params = [{transform_indices = @transform_0, window_bounds = array<i64: 4, 16, 16>}, {transform_indices = @transform_1, window_bounds = array<i64: 4, 16, 16>}]} {
    %c0 = arith.constant 0 : index
    %c0_0 = arith.constant 0 : index
    %c0_1 = arith.constant 0 : index
    %0 = vector.load %arg1[%c0, %c0_0, %c0_1] : memref<4x16x16xf32, #tpu.memory_space<vmem>>, vector<4x16x16xf32>
    %1 = vector.extract_strided_slice %0 {offsets = [0, 0, 4], sizes = [4, 16, 1], strides = [1, 1, 1]} : vector<4x16x16xf32> to vector<4x16x1xf32>
    %2 = vector.extract_strided_slice %0 {offsets = [0, 0, 3], sizes = [4, 16, 1], strides = [1, 1, 1]} : vector<4x16x16xf32> to vector<4x16x1xf32>
    %3 = vector.extract_strided_slice %0 {offsets = [0, 0, 2], sizes = [4, 16, 1], strides = [1, 1, 1]} : vector<4x16x16xf32> to vector<4x16x1xf32>
    %4 = vector.extract_strided_slice %0 {offsets = [0, 0, 1], sizes = [4, 16, 1], strides = [1, 1, 1]} : vector<4x16x16xf32> to vector<4x16x1xf32>
    %5 = vector.extract_strided_slice %0 {offsets = [0, 0, 14], sizes = [4, 16, 1], strides = [1, 1, 1]} : vector<4x16x16xf32> to vector<4x16x1xf32>
    %6 = vector.extract_strided_slice %0 {offsets = [0, 0, 13], sizes = [4, 16, 1], strides = [1, 1, 1]} : vector<4x16x16xf32> to vector<4x16x1xf32>
    %7 = vector.extract_strided_slice %0 {offsets = [0, 0, 12], sizes = [4, 16, 1], strides = [1, 1, 1]} : vector<4x16x16xf32> to vector<4x16x1xf32>
    %8 = vector.extract_strided_slice %0 {offsets = [0, 0, 11], sizes = [4, 16, 1], strides = [1, 1, 1]} : vector<4x16x16xf32> to vector<4x16x1xf32>
    %9 = tpu.concatenate %1, %2, %3, %4, %0, %5, %6, %7, %8 in 2 : vector<4x16x1xf32>, vector<4x16x1xf32>, vector<4x16x1xf32>, vector<4x16x1xf32>, vector<4x16x16xf32>, vector<4x16x1xf32>, vector<4x16x1xf32>, vector<4x16x1xf32>, vector<4x16x1xf32> -> vector<4x16x24xf32>
    %10 = vector.extract_strided_slice %9 {offsets = [0, 0, 0], sizes = [4, 16, 16], strides = [1, 1, 1]} : vector<4x16x24xf32> to vector<4x16x16xf32>
    %cst = arith.constant 0.00128301582 : f32
    %11 = vector.broadcast %cst : f32 to vector<4x16x16xf32>
    %12 = arith.mulf %11, %10 : vector<4x16x16xf32>
    %13 = vector.extract_strided_slice %9 {offsets = [0, 0, 1], sizes = [4, 16, 16], strides = [1, 1, 1]} : vector<4x16x24xf32> to vector<4x16x16xf32>
    %cst_2 = arith.constant 0.0145946387 : f32
    %14 = vector.broadcast %cst_2 : f32 to vector<4x16x16xf32>
    %15 = arith.mulf %14, %13 : vector<4x16x16xf32>
    %16 = arith.addf %12, %15 : vector<4x16x16xf32>
    %17 = vector.extract_strided_slice %9 {offsets = [0, 0, 2], sizes = [4, 16, 16], strides = [1, 1, 1]} : vector<4x16x24xf32> to vector<4x16x16xf32>
    %cst_3 = arith.constant 0.0828803181 : f32
    %18 = vector.broadcast %cst_3 : f32 to vector<4x16x16xf32>
    %19 = arith.mulf %18, %17 : vector<4x16x16xf32>
    %20 = arith.addf %16, %19 : vector<4x16x16xf32>
    %21 = vector.extract_strided_slice %9 {offsets = [0, 0, 3], sizes = [4, 16, 16], strides = [1, 1, 1]} : vector<4x16x24xf32> to vector<4x16x16xf32>
    %cst_4 = arith.constant 0.234966666 : f32
    %22 = vector.broadcast %cst_4 : f32 to vector<4x16x16xf32>
    %23 = arith.mulf %22, %21 : vector<4x16x16xf32>
    %24 = arith.addf %20, %23 : vector<4x16x16xf32>
    %25 = vector.extract_strided_slice %9 {offsets = [0, 0, 4], sizes = [4, 16, 16], strides = [1, 1, 1]} : vector<4x16x24xf32> to vector<4x16x16xf32>
    %cst_5 = arith.constant 0.332550704 : f32
    %26 = vector.broadcast %cst_5 : f32 to vector<4x16x16xf32>
    %27 = arith.mulf %26, %25 : vector<4x16x16xf32>
    %28 = arith.addf %24, %27 : vector<4x16x16xf32>
    %29 = vector.extract_strided_slice %9 {offsets = [0, 0, 5], sizes = [4, 16, 16], strides = [1, 1, 1]} : vector<4x16x24xf32> to vector<4x16x16xf32>
    %cst_6 = arith.constant 0.234966666 : f32
    %30 = vector.broadcast %cst_6 : f32 to vector<4x16x16xf32>
    %31 = arith.mulf %30, %29 : vector<4x16x16xf32>
    %32 = arith.addf %28, %31 : vector<4x16x16xf32>
    %33 = vector.extract_strided_slice %9 {offsets = [0, 0, 6], sizes = [4, 16, 16], strides = [1, 1, 1]} : vector<4x16x24xf32> to vector<4x16x16xf32>
    %cst_7 = arith.constant 0.0828803181 : f32
    %34 = vector.broadcast %cst_7 : f32 to vector<4x16x16xf32>
    %35 = arith.mulf %34, %33 : vector<4x16x16xf32>
    %36 = arith.addf %32, %35 : vector<4x16x16xf32>
    %37 = vector.extract_strided_slice %9 {offsets = [0, 0, 7], sizes = [4, 16, 16], strides = [1, 1, 1]} : vector<4x16x24xf32> to vector<4x16x16xf32>
    %cst_8 = arith.constant 0.0145946387 : f32
    %38 = vector.broadcast %cst_8 : f32 to vector<4x16x16xf32>
    %39 = arith.mulf %38, %37 : vector<4x16x16xf32>
    %40 = arith.addf %36, %39 : vector<4x16x16xf32>
    %41 = vector.extract_strided_slice %9 {offsets = [0, 0, 8], sizes = [4, 16, 16], strides = [1, 1, 1]} : vector<4x16x24xf32> to vector<4x16x16xf32>
    %cst_9 = arith.constant 0.00128301582 : f32
    %42 = vector.broadcast %cst_9 : f32 to vector<4x16x16xf32>
    %43 = arith.mulf %42, %41 : vector<4x16x16xf32>
    %44 = arith.addf %40, %43 : vector<4x16x16xf32>
    %45 = vector.extract_strided_slice %44 {offsets = [0, 1, 0], sizes = [4, 1, 16], strides = [1, 1, 1]} : vector<4x16x16xf32> to vector<4x1x16xf32>
    %46 = vector.extract_strided_slice %44 {offsets = [0, 14, 0], sizes = [4, 1, 16], strides = [1, 1, 1]} : vector<4x16x16xf32> to vector<4x1x16xf32>
    %47 = tpu.concatenate %45, %44, %46 in 1 : vector<4x1x16xf32>, vector<4x16x16xf32>, vector<4x1x16xf32> -> vector<4x18x16xf32>
    %48 = vector.extract_strided_slice %47 {offsets = [0, 0, 0], sizes = [4, 16, 16], strides = [1, 1, 1]} : vector<4x18x16xf32> to vector<4x16x16xf32>
    %cst_10 = arith.constant 0.0011927794 : f32
    %49 = vector.broadcast %cst_10 : f32 to vector<4x16x16xf32>
    %50 = arith.mulf %49, %48 : vector<4x16x16xf32>
    %51 = vector.extract_strided_slice %47 {offsets = [0, 1, 0], sizes = [4, 16, 16], strides = [1, 1, 1]} : vector<4x18x16xf32> to vector<4x16x16xf32>
    %cst_11 = arith.constant 0.997614443 : f32
    %52 = vector.broadcast %cst_11 : f32 to vector<4x16x16xf32>
    %53 = arith.mulf %52, %51 : vector<4x16x16xf32>
    %54 = arith.addf %50, %53 : vector<4x16x16xf32>
    %55 = vector.extract_strided_slice %47 {offsets = [0, 2, 0], sizes = [4, 16, 16], strides = [1, 1, 1]} : vector<4x18x16xf32> to vector<4x16x16xf32>
    %cst_12 = arith.constant 0.0011927794 : f32
    %56 = vector.broadcast %cst_12 : f32 to vector<4x16x16xf32>
    %57 = arith.mulf %56, %55 : vector<4x16x16xf32>
    %58 = arith.addf %54, %57 : vector<4x16x16xf32>
    %c0_13 = arith.constant 0 : index
    %c0_14 = arith.constant 0 : index
    %c0_15 = arith.constant 0 : index
    %59 = vector.load %arg2[%c0_13, %c0_14, %c0_15] : memref<4x16x16xf32, #tpu.memory_space<vmem>>, vector<4x16x16xf32>
    tpu.vector_store %arg2[%c0_13, %c0_14, %c0_15], %58 {strides = array<i32>} : memref<4x16x16xf32, #tpu.memory_space<vmem>>, vector<4x16x16xf32>,
    return
  }
  func.func @transform_0(%arg0: i32) -> (i32, i32, i32) {
    %c0_i32 = arith.constant 0 : i32
    %c0_i32_0 = arith.constant 0 : i32
    %c0_i32_1 = arith.constant 0 : i32
    return %arg0, %c0_i32, %c0_i32_0 : i32, i32, i32
  }
  func.func @transform_1(%arg0: i32) -> (i32, i32, i32) {
    %c0_i32 = arith.constant 0 : i32
    %c0_i32_0 = arith.constant 0 : i32
    %c0_i32_1 = arith.constant 0 : i32
    return %arg0, %c0_i32, %c0_i32_0 : i32, i32, i32
  }
}

</mosaic_0001>

<bundles_post_ra>
// kernel: tpu_custom_call.1
= control target key start
LH: loop header
LB: loop body
LE: loop exit
PB: predicated region body
PF: predicated region fallthrough
CT: control target
= control target key end

     0   :  { %6 = vsyncpa [#allocation3], 0  ;;  %s1835_s0 = inlined_call_operand.hbm [shape: f32[8,16,16], index: 0, kind: input, shape index: {}]   ;;  %s1836_s1 = inlined_call_operand.hbm [shape: f32[8,16,16], index: 1, kind: output, shape index: {}]  }
   0x1   :  { %8 = vsyncpa [#allocation3 + $0x1], 0 }
   0x2   :  { %9 = vsyncpa [#allocation4], 0 }
   0x3   :  { %11 = vsyncpa [#allocation4 + $0x1], 0  ;;  %s1236_s6 = smov 0   ;;  %s1238_s7 = smov 0  }
   0x4   :  { %s1240_s8 = smov 0   ;;  %s1242_s9 = smov 0  }
   0x5 LB: > { %s1257_s10 = sadd.s32 4294967295, %s1205_s9   ;;  %s1030_s11 = sadd.s32 4294967294, %s1205_s9   ;;  %s1205_s9 = sphi %s1242_s9, %s1857_s9   ;;  %s1201_s8 = sphi %s1240_s8, %s1856_s8   ;;  %s1197_s7 = sphi %s1238_s7, %s1855_s7   ;;  %s1193_s6 = sphi %s1236_s6, %s1854_s6  }
   0x6   : > { %s1261_s12 = sadd.s32 1, %s1205_s9   ;;  %s24_s13 = sadd.s32 1, %s1201_s8 }
   0x7   : > { %s21_s14 = ssub.s32 %s1205_s9, %s1261_s12  ;;  %p31_p0 = scmp.ne.s32.totalorder %s1201_s8, %s1197_s7 }
   0x8   : > { %p22_p1 = scmp.eq.s32.totalorder %s21_s14, 0  ;;  %p32_p2 = scmp.eq.s32.totalorder %s1205_s9, 0 }
   0x9   : > { %p37_p3 = scmp.ne.s32.totalorder %s1197_s7, %s1193_s6  ;;  %p38_p4 = scmp.eq.s32.totalorder %s1257_s10, 0 }
   0xa   : > { %s1273_s15 = scalar_select %p22_p1, %s1201_s8, %s24_s13  }
   0xb   : > { %p1275_p5 = por %p32_p2, %p31_p0  ;;  %p1279_p6 = por %p38_p4, %p37_p3 }
   0xc   : > { %p61_p7 = scmp.eq.s32.totalorder %s1257_s10, 1  ;;  %p67_p8 = scmp.eq.s32.totalorder %s1030_s11, 1 }
   0xd   : > { %s1840_s17 = scalar_select %p1279_p6, 1, 0 }
   0xe   : > { %p1062_p10 = scmp.lt.s32.totalorder %s1205_s9, 2  ;;  %p1286_p11 = por %p61_p7, %p31_p0 }
   0xf   : > { %p1290_p12 = por %p67_p8, %p37_p3  ;;  %s87_s20 = sand.u32 1, %s1201_s8  }
  0x10   : > { %s1841_s18 = scalar_select %p1286_p11, 1, 0 }
  0x11   : > { %s1842_s19 = scalar_select %p1290_p12, 1, 0 }
  0x12   : > { %s1047_s21 = sshll.u32 %s1205_s9, 10  ;;  %s1033_s22 = sshll.u32 %s87_s20, 6 }
  0x13   : > { %s1299_s25 = scalar_lea.hbm %s1835_s0, %s1047_s21  ;;  %s91_s26 = scalar_lea.vmem [#allocation2], %s1033_s22 }
  0x14   : > { %s99_s27 = sshll.u32 %s91_s26, 4  ;;  %p1303_p13 = pnand %p1062_p10, %p1275_p5  ;;  %s1307_s27 = int_to_ptr.vmem [resolvable:$true] %s99_s27 }
  0x15   : > { %s1309_s29 = scalar_lea.sflag [#allocation3], %s87_s20  ;;  %s1113_s30 = scalar_lea.hbm %s1299_s25, 1024 }
  0x16   : > { %p1114_p0 = scmp.ne.s32.totalorder %s1299_s25, %s1113_s30  ;;  %p1115_p1 = pneg %p1303_p13 }
  0x17   : > { %s1118_s4 = scalar_lea.hbm %s1835_s0, 2048  ;;  %p1119_p4 = scmp.lt.s32.totalorder %s1299_s25, %s1835_s0 }
  0x18   : > { %p1116_p2 = pnand %p1115_p1, %p1114_p0  ;;  %p1120_p5 = scmp.lt.s32.totalorder %s1118_s4, %s1113_s30 }
  0x1a   : > { %p1117_p3 = pneg %p1116_p2  ;;  %p1121_p7 = por %p1120_p5, %p1119_p4 }
  0x1c   : > { %p1122_p8 = pnand %p1121_p7, %p1117_p3 }
  0x1e   : > { %1125 = shalt.err (!%p1122_p8)
}
  0x1f   : > { %s1126_s13 = scalar_lea.vmem %s1307_s27, 1024  ;;  %s1207_s14 = smov [#allocation2]  }
  0x20   : > { %p1127_p10 = scmp.ne.s32.totalorder %s1307_s27, %s1126_s13  ;;  %s1131_s16 = sshll.u32 %s1207_s14, 4  ;;  %s1132_s16 = int_to_ptr.vmem [resolvable:$false] %s1131_s16 }
  0x21   : > { %s1133_s20 = scalar_lea.vmem %s1132_s16, 2048  ;;  %p1134_p2 = scmp.lt.s32.totalorder %s1307_s27, %s1132_s16 }
  0x22   : > { %p1129_p9 = pnand %p1127_p10, %p1115_p1  ;;  %p1135_p12 = scmp.lt.s32.totalorder %s1133_s20, %s1126_s13 }
  0x24   : > { %p1130_p0 = pneg %p1129_p9  ;;  %p1136_p11 = por %p1135_p12, %p1134_p2 }
  0x26   : > { %p1137_p6 = pnand %p1136_p11, %p1130_p0 }
  0x28   : > { %1140 = shalt.err (!%p1137_p6)
}
  0x29   : > { %s1208_s21 = smov 128   ;;  %s1209_s22 = smov 8  }
  0x2a   : > { %1057 = dma.hbm_to_vmem [thread:$0]  (!%p1303_p13), %s1299_s25, 1024, %s1307_s27, %s1309_s29, %s1208_s21, %s1208_s21, %s1209_s22  }
  0x2b   : > { %p1037_p9 = scmp.ge.s32.totalorder %s1205_s9, 1  ;;  %p107_p1 = scmp.lt.s32.totalorder %s1205_s9, 3 }
  0x2d   : > { %p108_p3 = pnand %p1037_p9, %p107_p1 }
  0x2f   : > { %111 = sbr.rel (%p108_p3) target bundleno = 565 (0x235), region = 24 }
  0x34   : > { %s1333_s23 = sand.u32 1, %s1197_s7   ;;  %p1844_p6 = scmp.ne.s32.totalorder %s1840_s17, 0 }
  0x35   : > { %s1038_s24 = sshll.u32 %s1333_s23, 6  ;;  %s114_s26 = scalar_lea.sflag [#allocation3], %s1333_s23 }
  0x36   : > { %s117_s30 = scalar_lea.vmem [#allocation2], %s1038_s24 }
  0x37   : > { %1184 = dma.done.wait (%p1844_p6), %s114_s26, 1024  }
  0x38   : > { %1186 = vsyncadd (%p1844_p6), %s114_s26, 4294966272  ;;  %v1343_v0 = vld [vmem:[%s117_s30 + $0x10] sm:$0xff]  ;;  %v1345_v1 = vld [vmem:[%s117_s30] sm:$0xff]  ;;  %s1210_s25 = smov 124   ;;  %s1211_s17 = smov 126   ;;  %vm346_vm0 = vcmask 7168  }
  0x39   : > { %158 = vrot.lane.b32.xlu1 %v1343_v0, %s1210_s25  ;;  %154 = vrot.lane.b32.xlu0 %v1345_v1, %s1210_s25  ;;  %v1351_v2 = vld [vmem:[%s117_s30 + $0x18] sm:$0xff]  ;;  %v1353_v3 = vld [vmem:[%s117_s30 + $0x8] sm:$0xff]  ;;  %s1212_s27 = smov 2   ;;  %s1213_s28 = smov 4   ;;  %vm355_vm1 = vcmask 15360   ;;  %vm364_vm2 = vcmask 23552  }
  0x3a   : > { %v1359_v4 = vld [vmem:[%s117_s30 + $0x28] sm:$0xff]  ;;  %v1361_v5 = vld [vmem:[%s117_s30 + $0x20] sm:$0xff]  ;;  %v1367_v6 = vld [vmem:[%s117_s30 + $0x38] sm:$0xff]  ;;  %s1214_s29 = smov 6   ;;  %s1215_s2 = smov 8   ;;  %vm373_vm3 = vcmask 31744  }
  0x3b   : > { %v1369_v7 = vld [vmem:[%s117_s30 + $0x30] sm:$0xff]  ;;  %s1216_s3 = smov 10   ;;  %s1217_s4 = smov 12   ;;  %vm382_vm4 = vcmask 162816   ;;  %vm391_vm5 = vcmask 171008   ;;  %vm400_vm6 = vcmask 179200  }
  0x3c   : > { %vm409_vm7 = vcmask 187392   ;;  %s1218_s5 = smov 127   ;;  %s1219_s11 = smov 125   ;;  %vm770_vm8 = vcmask 1040384   ;;  %vm843_vm9 = vcmask 1046528   ;;  %vm896_vm10 = vcmask 1045504  }
  0x3d   : > { %160 = vrot.lane.b32.xlu1 %v1351_v2, %s1210_s25  ;;  %156 = vrot.lane.b32.xlu0 %v1353_v3, %s1210_s25  ;;  %s1220_s13 = smov 123   ;;  %s1221_s14 = smov 122   ;;  %vm933_vm11 = vcmask 130048  }
  0x3e   : > { %s1222_s16 = smov 121   ;;  %s1223_s20 = smov 120  }
  0x3f   : > { %s1747_s21 = scalar_lea.vmem [#allocation5], %s1038_s24  ;;  %s1049_s22 = sshll.u32 %s1257_s10, 10 }
  0x40   : > { %s957_s24 = sshll.u32 %s1747_s21, 4  ;;  %s943_s10 = scalar_lea.sflag [#allocation4], %s1333_s23  ;;  %s1787_s24 = int_to_ptr.vmem [resolvable:$true] %s957_s24 }
  0x41   : > { %164 = vrot.lane.b32.xlu1 %v1359_v4, %s1210_s25  ;;  %162 = vrot.lane.b32.xlu0 %v1361_v5, %s1210_s25  ;;  %p1851_p12 = scmp.ne.s32.totalorder %s1841_s18, 0 }
  0x45   : > { %168 = vrot.lane.b32.xlu1 %v1367_v6, %s1210_s25  ;;  %166 = vrot.lane.b32.xlu0 %v1369_v7, %s1210_s25 }
  0x49   : > { %180 = vrot.lane.b32.xlu1 %v1353_v3, %s1211_s17  ;;  %178 = vrot.lane.b32.xlu0 %v1345_v1, %s1211_s17 }
  0x4d   : > { %184 = vrot.lane.b32.xlu1 %v1351_v2, %s1211_s17  ;;  %182 = vrot.lane.b32.xlu0 %v1343_v0, %s1211_s17 }
  0x51   : > { %188 = vrot.lane.b32.xlu1 %v1359_v4, %s1211_s17  ;;  %186 = vrot.lane.b32.xlu0 %v1361_v5, %s1211_s17 }
  0x55   : > { %192 = vrot.lane.b32.xlu1 %v1367_v6, %s1211_s17  ;;  %190 = vrot.lane.b32.xlu0 %v1369_v7, %s1211_s17 }
  0x59   : > { %204 = vrot.lane.b32.xlu1 %v1353_v3, %s1212_s27  ;;  %202 = vrot.lane.b32.xlu0 %v1345_v1, %s1212_s27 }
  0x5d   : > { %208 = vrot.lane.b32.xlu1 %v1351_v2, %s1212_s27  ;;  %206 = vrot.lane.b32.xlu0 %v1343_v0, %s1212_s27 }
  0x61   : > { %212 = vrot.lane.b32.xlu1 %v1359_v4, %s1212_s27  ;;  %210 = vrot.lane.b32.xlu0 %v1361_v5, %s1212_s27 }
  0x65   : > { %216 = vrot.lane.b32.xlu1 %v1367_v6, %s1212_s27  ;;  %214 = vrot.lane.b32.xlu0 %v1369_v7, %s1212_s27  ;;  %s1224_s27 = smov [#allocation5]  }
  0x69   : > { %228 = vrot.lane.b32.xlu1 %v1353_v3, %s1213_s28  ;;  %226 = vrot.lane.b32.xlu0 %v1345_v1, %s1213_s28 }
  0x6d   : > { %232 = vrot.lane.b32.xlu1 %v1351_v2, %s1213_s28  ;;  %230 = vrot.lane.b32.xlu0 %v1343_v0, %s1213_s28 }
  0x71   : > { %236 = vrot.lane.b32.xlu1 %v1359_v4, %s1213_s28  ;;  %234 = vrot.lane.b32.xlu0 %v1361_v5, %s1213_s28 }
  0x75   : > { %240 = vrot.lane.b32.xlu1 %v1367_v6, %s1213_s28  ;;  %238 = vrot.lane.b32.xlu0 %v1369_v7, %s1213_s28  ;;  %s1145_s28 = sshll.u32 %s1224_s27, 4  ;;  %s1146_s28 = int_to_ptr.vmem [resolvable:$false] %s1145_s28 }
  0x76   : > { %p1148_p5 = scmp.lt.s32.totalorder %s1787_s24, %s1146_s28 }
  0x79   : > { %252 = vrot.lane.b32.xlu1 %v1353_v3, %s1214_s29  ;;  %250 = vrot.lane.b32.xlu0 %v1345_v1, %s1214_s29 }
  0x7d   : > { %256 = vrot.lane.b32.xlu1 %v1351_v2, %s1214_s29  ;;  %254 = vrot.lane.b32.xlu0 %v1343_v0, %s1214_s29 }
  0x81   : > { %260 = vrot.lane.b32.xlu1 %v1359_v4, %s1214_s29  ;;  %258 = vrot.lane.b32.xlu0 %v1361_v5, %s1214_s29 }
  0x85   : > { %264 = vrot.lane.b32.xlu1 %v1367_v6, %s1214_s29  ;;  %262 = vrot.lane.b32.xlu0 %v1369_v7, %s1214_s29  ;;  %s1147_s29 = scalar_lea.vmem %s1146_s28, 2048 }
  0x89   : > { %276 = vrot.lane.b32.xlu1 %v1353_v3, %s1215_s2  ;;  %274 = vrot.lane.b32.xlu0 %v1345_v1, %s1215_s2 }
  0x8d   : > { %280 = vrot.lane.b32.xlu1 %v1351_v2, %s1215_s2  ;;  %278 = vrot.lane.b32.xlu0 %v1343_v0, %s1215_s2 }
  0x91   : > { %284 = vrot.lane.b32.xlu1 %v1359_v4, %s1215_s2  ;;  %282 = vrot.lane.b32.xlu0 %v1361_v5, %s1215_s2 }
  0x95   : > { %288 = vrot.lane.b32.xlu1 %v1367_v6, %s1215_s2  ;;  %286 = vrot.lane.b32.xlu0 %v1369_v7, %s1215_s2 }
  0x99   : > { %300 = vrot.lane.b32.xlu1 %v1353_v3, %s1216_s3  ;;  %298 = vrot.lane.b32.xlu0 %v1345_v1, %s1216_s3 }
  0x9d   : > { %304 = vrot.lane.b32.xlu1 %v1351_v2, %s1216_s3  ;;  %302 = vrot.lane.b32.xlu0 %v1343_v0, %s1216_s3 }
  0xa1   : > { %308 = vrot.lane.b32.xlu1 %v1359_v4, %s1216_s3  ;;  %306 = vrot.lane.b32.xlu0 %v1361_v5, %s1216_s3 }
  0xa5   : > { %312 = vrot.lane.b32.xlu1 %v1367_v6, %s1216_s3  ;;  %310 = vrot.lane.b32.xlu0 %v1369_v7, %s1216_s3 }
  0xa9   : > { %324 = vrot.lane.b32.xlu1 %v1353_v3, %s1217_s4  ;;  %322 = vrot.lane.b32.xlu0 %v1345_v1, %s1217_s4 }
  0xab   : > { %v1441_v8 = vpop.permute.xlu1 %158  ;;  %v155_v9 = vpop.permute.xlu0 %154 }
  0xad   : > { %328 = vrot.lane.b32.xlu1 %v1351_v2, %s1217_s4  ;;  %326 = vrot.lane.b32.xlu0 %v1343_v0, %s1217_s4 }
  0xaf   : > { %v1445_v10 = vpop.permute.xlu1 %160  ;;  %v157_v11 = vpop.permute.xlu0 %156 }
  0xb1   : > { %332 = vrot.lane.b32.xlu1 %v1359_v4, %s1217_s4  ;;  %330 = vrot.lane.b32.xlu0 %v1361_v5, %s1217_s4 }
  0xb3   : > { %v1449_v12 = vpop.permute.xlu1 %164  ;;  %v1451_v13 = vpop.permute.xlu0 %162 }
  0xb5   : > { %336 = vrot.lane.b32.xlu1 %v1367_v6, %s1217_s4  ;;  %334 = vrot.lane.b32.xlu0 %v1369_v7, %s1217_s4 }
  0xb7   : > { %v1455_v14 = vpop.permute.xlu1 %168  ;;  %v1457_v15 = vpop.permute.xlu0 %166 }
  0xbb   : > { %v181_v16 = vpop.permute.xlu1 %180  ;;  %v179_v17 = vpop.permute.xlu0 %178 }
  0xbc   : > { %v348_v60 = vsel %vm346_vm0, %v157_v11, %v181_v16  ;;  %v347_v61 = vsel %vm346_vm0, %v155_v9, %v179_v17 }
  0xbd   : > { %v357_v16 = vsel %vm355_vm1, %v348_v60, %v1353_v3  ;;  %v356_v17 = vsel %vm355_vm1, %v347_v61, %v1345_v1 }
  0xbf   : > { %v185_v18 = vpop.permute.xlu1 %184  ;;  %v183_v19 = vpop.permute.xlu0 %182 }
  0xc3   : > { %v189_v20 = vpop.permute.xlu1 %188  ;;  %v187_v21 = vpop.permute.xlu0 %186 }
  0xc4   : > { %v352_v11 = vsel %vm346_vm0, %v1449_v12, %v189_v20  ;;  %v351_v9 = vsel %vm346_vm0, %v1451_v13, %v187_v21 }
  0xc5   : > { %v360_v20 = vsel %vm355_vm1, %v351_v9, %v1361_v5 }
  0xc7   : > { %v1459_v22 = vpop.permute.xlu1 %192  ;;  %v1461_v23 = vpop.permute.xlu0 %190 }
  0xcb   : > { %v205_v24 = vpop.permute.xlu1 %204  ;;  %v203_v25 = vpop.permute.xlu0 %202 }
  0xcf   : > { %v1463_v26 = vpop.permute.xlu1 %208  ;;  %v1465_v27 = vpop.permute.xlu0 %206 }
  0xd3   : > { %v1467_v28 = vpop.permute.xlu1 %212  ;;  %v1469_v29 = vpop.permute.xlu0 %210 }
  0xd7   : > { %v1471_v30 = vpop.permute.xlu1 %216  ;;  %v1473_v31 = vpop.permute.xlu0 %214 }
  0xdb   : > { %v229_v32 = vpop.permute.xlu1 %228  ;;  %v227_v33 = vpop.permute.xlu0 %226 }
  0xdf   : > { %v1475_v34 = vpop.permute.xlu1 %232  ;;  %v1477_v35 = vpop.permute.xlu0 %230 }
  0xe3   : > { %v1479_v36 = vpop.permute.xlu1 %236  ;;  %v1481_v37 = vpop.permute.xlu0 %234 }
  0xe7   : > { %v1483_v38 = vpop.permute.xlu1 %240  ;;  %v1485_v39 = vpop.permute.xlu0 %238 }
  0xeb   : > { %v253_v40 = vpop.permute.xlu1 %252  ;;  %v251_v41 = vpop.permute.xlu0 %250 }
  0xef   : > { %v1487_v42 = vpop.permute.xlu1 %256  ;;  %v1489_v43 = vpop.permute.xlu0 %254 }
  0xf3   : > { %v1491_v44 = vpop.permute.xlu1 %260  ;;  %v1493_v45 = vpop.permute.xlu0 %258 }
  0xf7   : > { %v1495_v46 = vpop.permute.xlu1 %264  ;;  %v1497_v47 = vpop.permute.xlu0 %262 }
  0xf8   : > { %1845 = vst [vmem:[#allocation8_spill] sm:$0xff] %v1497_v47  ;;  %v366_v47 = vsel %vm364_vm2, %v357_v16, %v205_v24 }
  0xf9   : > { %v375_v3 = vsel %vm373_vm3, %v366_v47, %v229_v32 }
  0xfa   : > { %v384_v21 = vsel %vm382_vm4, %v375_v3, %v253_v40 }
  0xfb   : > { %v277_v48 = vpop.permute.xlu1 %276  ;;  %v275_v49 = vpop.permute.xlu0 %274 }
  0xff   : > { %v281_v50 = vpop.permute.xlu1 %280  ;;  %v279_v51 = vpop.permute.xlu0 %278 }
 0x103   : > { %v1499_v52 = vpop.permute.xlu1 %284  ;;  %v1501_v53 = vpop.permute.xlu0 %282 }
 0x107   : > { %v1503_v54 = vpop.permute.xlu1 %288  ;;  %v1505_v55 = vpop.permute.xlu0 %286 }
 0x108   : > { %1846 = vst [vmem:[#allocation9_spill] sm:$0xff] %v1503_v54  ;;  %1847 = vst [vmem:[#allocation10_spill] sm:$0xff] %v1505_v55  ;;  %v350_v54 = vsel %vm346_vm0, %v1445_v10, %v185_v18  ;;  %v349_v55 = vsel %vm346_vm0, %v1441_v8, %v183_v19  ;;  %v365_v10 = vsel %vm364_vm2, %v356_v17, %v203_v25 }
 0x109   : > { %v359_v12 = vsel %vm355_vm1, %v350_v54, %v1351_v2  ;;  %v358_v13 = vsel %vm355_vm1, %v349_v55, %v1343_v0  ;;  %v374_v1 = vsel %vm373_vm3, %v365_v10, %v227_v33  ;;  %v361_v19 = vsel %vm355_vm1, %v352_v11, %v1359_v4 }
 0x10a   : > { %v383_v24 = vsel %vm382_vm4, %v374_v1, %v251_v41  ;;  %v354_v2 = vsel %vm346_vm0, %v1455_v14, %v1459_v22  ;;  %v353_v0 = vsel %vm346_vm0, %v1457_v15, %v1461_v23  ;;  %v393_v25 = vsel %vm391_vm5, %v384_v21, %v277_v48 }
 0x10b   : > { %v301_v56 = vpop.permute.xlu1 %300  ;;  %v299_v57 = vpop.permute.xlu0 %298  ;;  %v392_v32 = vsel %vm391_vm5, %v383_v24, %v275_v49  ;;  %v368_v4 = vsel %vm364_vm2, %v359_v12, %v1463_v26  ;;  %v367_v5 = vsel %vm364_vm2, %v358_v13, %v1465_v27  ;;  %v363_v49 = vsel %vm355_vm1, %v354_v2, %v1367_v6 }
 0x10c   : > { %v402_v33 = vsel %vm400_vm6, %v393_v25, %v301_v56  ;;  %v401_v40 = vsel %vm400_vm6, %v392_v32, %v299_v57  ;;  %v377_v22 = vsel %vm373_vm3, %v368_v4, %v1475_v34  ;;  %v376_v15 = vsel %vm373_vm3, %v367_v5, %v1477_v35 }
 0x10d   : > { %v386_v27 = vsel %vm382_vm4, %v377_v22, %v1487_v42  ;;  %v385_v47 = vsel %vm382_vm4, %v376_v15, %v1489_v43  ;;  %v370_v35 = vsel %vm364_vm2, %v361_v19, %v1467_v28  ;;  %v369_v42 = vsel %vm364_vm2, %v360_v20, %v1469_v29 }
 0x10e   : > { %v395_v54 = vsel %vm391_vm5, %v386_v27, %v281_v50  ;;  %v394_v55 = vsel %vm391_vm5, %v385_v47, %v279_v51  ;;  %v379_v28 = vsel %vm373_vm3, %v370_v35, %v1479_v36  ;;  %v378_v50 = vsel %vm373_vm3, %v369_v42, %v1481_v37 }
 0x10f   : > { %v305_v58 = vpop.permute.xlu1 %304  ;;  %v303_v59 = vpop.permute.xlu0 %302  ;;  %v372_v37 = vsel %vm364_vm2, %v363_v49, %v1471_v30  ;;  %v362_v61 = vsel %vm355_vm1, %v353_v0, %v1369_v7  ;;  %v1849_v13 = vld [vmem:[#allocation9_spill] sm:$0xff]  ;;  %v1850_v3 = vld [vmem:[#allocation10_spill] sm:$0xff] }
 0x110   : > { %v404_v43 = vsel %vm400_vm6, %v395_v54, %v305_v58  ;;  %v403_v56 = vsel %vm400_vm6, %v394_v55, %v303_v59  ;;  %v388_v58 = vsel %vm382_vm4, %v379_v28, %v1491_v44  ;;  %v387_v59 = vsel %vm382_vm4, %v378_v50, %v1493_v45 }
 0x111   : > { %v397_v11 = vsel %vm391_vm5, %v388_v58, %v1499_v52  ;;  %v396_v44 = vsel %vm391_vm5, %v387_v59, %v1501_v53  ;;  %v371_v45 = vsel %vm364_vm2, %v362_v61, %v1473_v31  ;;  %v381_v30 = vsel %vm373_vm3, %v372_v37, %v1483_v38 }
 0x112   : > { %v380_v31 = vsel %vm373_vm3, %v371_v45, %v1485_v39 }
 0x113   : > { %v1509_v62 = vpop.permute.xlu1 %308  ;;  %v1511_v63 = vpop.permute.xlu0 %306 }
 0x114   : > { %v406_v9 = vsel %vm400_vm6, %v397_v11, %v1509_v62  ;;  %v405_v16 = vsel %vm400_vm6, %v396_v44, %v1511_v63  ;;  %v390_v62 = vsel %vm382_vm4, %v381_v30, %v1495_v46  ;;  %v1848_v63 = vld [vmem:[#allocation8_spill] sm:$0xff] }
 0x115   : > { %v389_v10 = vsel %vm382_vm4, %v380_v31, %v1848_v63  ;;  %v399_v39 = vsel %vm391_vm5, %v390_v62, %v1849_v13 }
 0x116   : > { %v398_v1 = vsel %vm391_vm5, %v389_v10, %v1850_v3 }
 0x117   : > { %v1527_v8 = vpop.permute.xlu1 %312  ;;  %v1529_v18 = vpop.permute.xlu0 %310 }
 0x118   : > { %v408_v19 = vsel %vm400_vm6, %v399_v39, %v1527_v8  ;;  %v407_v46 = vsel %vm400_vm6, %v398_v1, %v1529_v18 }
 0x11b   : > { %v325_v41 = vpop.permute.xlu1 %324  ;;  %v323_v14 = vpop.permute.xlu0 %322 }
 0x11c   : > { %v1562_v23 = vsel %vm409_vm7, %v402_v33, %v325_v41  ;;  %v1565_v26 = vsel %vm409_vm7, %v401_v40, %v323_v14 }
 0x11d   : > { %v1572_v48 = vmul.f32 0.014594639, %v1562_v23  ;;  %v1575_v34 = vmul.f32 0.014594639, %v1565_v26  ;;  %v475_v18 = vmul.f32 0.08288032, %v1562_v23 }
 0x11e   : > { %v474_v25 = vmul.f32 0.08288032, %v1565_v26  ;;  %v523_v14 = vmul.f32 0.23496667, %v1562_v23  ;;  %v522_v22 = vmul.f32 0.23496667, %v1565_v26 }
 0x11f   : > { %v329_v57 = vpop.permute.xlu1 %328  ;;  %444 = vrot.lane.b32.xlu1 %v1572_v48, %s1218_s5  ;;  %442 = vrot.lane.b32.xlu0 %v1575_v34, %s1218_s5  ;;  %v327_v6 = vpop.permute.xlu0 %326  ;;  %v571_v55 = vmul.f32 0.3325507, %v1562_v23  ;;  %v570_v42 = vmul.f32 0.3325507, %v1565_v26  ;;  %v419_v58 = vmul.f32 0.0012830158, %v1562_v23 }
 0x120   : > { %v1596_v29 = vsel %vm409_vm7, %v404_v43, %v329_v57  ;;  %v1599_v51 = vsel %vm409_vm7, %v403_v56, %v327_v6  ;;  %v418_v59 = vmul.f32 0.0012830158, %v1565_v26 }
 0x121   : > { %v1606_v60 = vmul.f32 0.014594639, %v1596_v29  ;;  %v1609_v36 = vmul.f32 0.014594639, %v1599_v51  ;;  %v477_v32 = vmul.f32 0.08288032, %v1596_v29 }
 0x122   : > { %v476_v4 = vmul.f32 0.08288032, %v1599_v51  ;;  %v525_v15 = vmul.f32 0.23496667, %v1596_v29  ;;  %v524_v27 = vmul.f32 0.23496667, %v1599_v51 }
 0x123   : > { %v333_v17 = vpop.permute.xlu1 %332  ;;  %448 = vrot.lane.b32.xlu1 %v1606_v60, %s1218_s5  ;;  %446 = vrot.lane.b32.xlu0 %v1609_v36, %s1218_s5  ;;  %v331_v7 = vpop.permute.xlu0 %330  ;;  %v573_v43 = vmul.f32 0.3325507, %v1596_v29  ;;  %v572_v56 = vmul.f32 0.3325507, %v1599_v51 }
 0x124   : > { %v1634_v52 = vsel %vm409_vm7, %v406_v9, %v333_v17  ;;  %v1637_v53 = vsel %vm409_vm7, %v405_v16, %v331_v7 }
 0x125   : > { %v1644_v12 = vmul.f32 0.014594639, %v1634_v52  ;;  %v1647_v38 = vmul.f32 0.014594639, %v1637_v53  ;;  %v479_v5 = vmul.f32 0.08288032, %v1634_v52 }
 0x126   : > { %v478_v33 = vmul.f32 0.08288032, %v1637_v53  ;;  %v527_v47 = vmul.f32 0.23496667, %v1634_v52  ;;  %v526_v35 = vmul.f32 0.23496667, %v1637_v53 }
 0x127   : > { %v337_v20 = vpop.permute.xlu1 %336  ;;  %452 = vrot.lane.b32.xlu1 %v1644_v12, %s1218_s5  ;;  %450 = vrot.lane.b32.xlu0 %v1647_v38, %s1218_s5  ;;  %v335_v21 = vpop.permute.xlu0 %334  ;;  %v575_v57 = vmul.f32 0.3325507, %v1634_v52  ;;  %v574_v6 = vmul.f32 0.3325507, %v1637_v53  ;;  %v423_v45 = vmul.f32 0.0012830158, %v1634_v52 }
 0x128   : > { %v1662_v24 = vsel %vm409_vm7, %v408_v19, %v337_v20  ;;  %v1665_v2 = vsel %vm409_vm7, %v407_v46, %v335_v21  ;;  %v422_v23 = vmul.f32 0.0012830158, %v1637_v53 }
 0x129   : > { %v1668_v0 = vmul.f32 0.014594639, %v1662_v24  ;;  %v1671_v8 = vmul.f32 0.014594639, %v1665_v2  ;;  %v481_v40 = vmul.f32 0.08288032, %v1662_v24 }
 0x12a   : > { %v480_v41 = vmul.f32 0.08288032, %v1665_v2  ;;  %v529_v49 = vmul.f32 0.23496667, %v1662_v24  ;;  %v528_v54 = vmul.f32 0.23496667, %v1665_v2 }
 0x12b   : > { %456 = vrot.lane.b32.xlu1 %v1668_v0, %s1218_s5  ;;  %454 = vrot.lane.b32.xlu0 %v1671_v8, %s1218_s5  ;;  %v577_v28 = vmul.f32 0.3325507, %v1662_v24  ;;  %v576_v50 = vmul.f32 0.3325507, %v1665_v2 }
 0x12f   : > { %492 = vrot.lane.b32.xlu1 %v475_v18, %s1211_s17  ;;  %490 = vrot.lane.b32.xlu0 %v474_v25, %s1211_s17 }
 0x133   : > { %496 = vrot.lane.b32.xlu1 %v477_v32, %s1211_s17  ;;  %494 = vrot.lane.b32.xlu0 %v476_v4, %s1211_s17 }
 0x137   : > { %500 = vrot.lane.b32.xlu1 %v479_v5, %s1211_s17  ;;  %498 = vrot.lane.b32.xlu0 %v478_v33, %s1211_s17 }
 0x13b   : > { %504 = vrot.lane.b32.xlu1 %v481_v40, %s1211_s17  ;;  %502 = vrot.lane.b32.xlu0 %v480_v41, %s1211_s17  ;;  %s1141_s17 = scalar_lea.vmem %s1787_s24, 1024 }
 0x13c   : > { %p1142_p11 = scmp.ne.s32.totalorder %s1787_s24, %s1141_s17  ;;  %p1149_p7 = scmp.lt.s32.totalorder %s1147_s29, %s1141_s17 }
 0x13e   : > { %p1143_p13 = pnand %p1142_p11, %p1851_p12  ;;  %p1150_p8 = por %p1149_p7, %p1148_p5 }
 0x13f   : > { %540 = vrot.lane.b32.xlu1 %v523_v14, %s1219_s11  ;;  %538 = vrot.lane.b32.xlu0 %v522_v22, %s1219_s11 }
 0x140   : > { %p1144_p4 = pneg %p1143_p13 }
 0x142   : > { %p1151_p10 = pnand %p1150_p8, %p1144_p4 }
 0x143   : > { %544 = vrot.lane.b32.xlu1 %v525_v15, %s1219_s11  ;;  %542 = vrot.lane.b32.xlu0 %v524_v27, %s1219_s11 }
 0x147   : > { %548 = vrot.lane.b32.xlu1 %v527_v47, %s1219_s11  ;;  %546 = vrot.lane.b32.xlu0 %v526_v35, %s1219_s11 }
 0x14b   : > { %552 = vrot.lane.b32.xlu1 %v529_v49, %s1219_s11  ;;  %550 = vrot.lane.b32.xlu0 %v528_v54, %s1219_s11 }
 0x14f   : > { %588 = vrot.lane.b32.xlu1 %v571_v55, %s1210_s25  ;;  %586 = vrot.lane.b32.xlu0 %v570_v42, %s1210_s25 }
 0x153   : > { %592 = vrot.lane.b32.xlu1 %v573_v43, %s1210_s25  ;;  %590 = vrot.lane.b32.xlu0 %v572_v56, %s1210_s25 }
 0x157   : > { %596 = vrot.lane.b32.xlu1 %v575_v57, %s1210_s25  ;;  %594 = vrot.lane.b32.xlu0 %v574_v6, %s1210_s25 }
 0x15b   : > { %600 = vrot.lane.b32.xlu1 %v577_v28, %s1210_s25  ;;  %598 = vrot.lane.b32.xlu0 %v576_v50, %s1210_s25  ;;  %s1785_s25 = scalar_lea.hbm %s1836_s1, %s1049_s22 }
 0x15f   : > { %620 = vrot.lane.b32.xlu1 %v523_v14, %s1220_s13  ;;  %618 = vrot.lane.b32.xlu0 %v522_v22, %s1220_s13 }
 0x163   : > { %624 = vrot.lane.b32.xlu1 %v525_v15, %s1220_s13  ;;  %622 = vrot.lane.b32.xlu0 %v524_v27, %s1220_s13 }
 0x167   : > { %628 = vrot.lane.b32.xlu1 %v527_v47, %s1220_s13  ;;  %626 = vrot.lane.b32.xlu0 %v526_v35, %s1220_s13 }
 0x16b   : > { %632 = vrot.lane.b32.xlu1 %v529_v49, %s1220_s13  ;;  %630 = vrot.lane.b32.xlu0 %v528_v54, %s1220_s13 }
 0x16f   : > { %652 = vrot.lane.b32.xlu1 %v475_v18, %s1221_s14  ;;  %650 = vrot.lane.b32.xlu0 %v474_v25, %s1221_s14 }
 0x173   : > { %656 = vrot.lane.b32.xlu1 %v477_v32, %s1221_s14  ;;  %654 = vrot.lane.b32.xlu0 %v476_v4, %s1221_s14 }
 0x177   : > { %660 = vrot.lane.b32.xlu1 %v479_v5, %s1221_s14  ;;  %658 = vrot.lane.b32.xlu0 %v478_v33, %s1221_s14 }
 0x17b   : > { %664 = vrot.lane.b32.xlu1 %v481_v40, %s1221_s14  ;;  %662 = vrot.lane.b32.xlu0 %v480_v41, %s1221_s14 }
 0x17f   : > { %684 = vrot.lane.b32.xlu1 %v1572_v48, %s1222_s16  ;;  %682 = vrot.lane.b32.xlu0 %v1575_v34, %s1222_s16 }
 0x183   : > { %688 = vrot.lane.b32.xlu1 %v1606_v60, %s1222_s16  ;;  %686 = vrot.lane.b32.xlu0 %v1609_v36, %s1222_s16  ;;  %v421_v60 = vmul.f32 0.0012830158, %v1596_v29  ;;  %v420_v36 = vmul.f32 0.0012830158, %v1599_v51  ;;  %v425_v29 = vmul.f32 0.0012830158, %v1662_v24 }
 0x184   : > { %v424_v51 = vmul.f32 0.0012830158, %v1665_v2 }
 0x187   : > { %692 = vrot.lane.b32.xlu1 %v1644_v12, %s1222_s16  ;;  %690 = vrot.lane.b32.xlu0 %v1647_v38, %s1222_s16 }
 0x18b   : > { %696 = vrot.lane.b32.xlu1 %v1668_v0, %s1222_s16  ;;  %694 = vrot.lane.b32.xlu0 %v1671_v8, %s1222_s16 }
 0x18f   : > { %724 = vrot.lane.b32.xlu1 %v419_v58, %s1223_s20  ;;  %722 = vrot.lane.b32.xlu0 %v418_v59, %s1223_s20 }
 0x191   : > { %v445_v48 = vpop.permute.xlu1 %444  ;;  %v443_v34 = vpop.permute.xlu0 %442 }
 0x192   : > { %v467_v37 = vadd.f32 %v445_v48, %v419_v58  ;;  %v466_v61 = vadd.f32 %v443_v34, %v418_v59 }
 0x193   : > { %728 = vrot.lane.b32.xlu1 %v421_v60, %s1223_s20  ;;  %726 = vrot.lane.b32.xlu0 %v420_v36, %s1223_s20 }
 0x195   : > { %v449_v11 = vpop.permute.xlu1 %448  ;;  %v447_v44 = vpop.permute.xlu0 %446 }
 0x196   : > { %v469_v26 = vadd.f32 %v449_v11, %v421_v60  ;;  %v468_v9 = vadd.f32 %v447_v44, %v420_v36 }
 0x197   : > { %732 = vrot.lane.b32.xlu1 %v423_v45, %s1223_s20  ;;  %730 = vrot.lane.b32.xlu0 %v422_v23, %s1223_s20 }
 0x199   : > { %v453_v16 = vpop.permute.xlu1 %452  ;;  %v451_v17 = vpop.permute.xlu0 %450 }
 0x19a   : > { %v471_v7 = vadd.f32 %v453_v16, %v423_v45  ;;  %v470_v30 = vadd.f32 %v451_v17, %v422_v23 }
 0x19b   : > { %736 = vrot.lane.b32.xlu1 %v425_v29, %s1223_s20  ;;  %734 = vrot.lane.b32.xlu0 %v424_v51, %s1223_s20 }
 0x19d   : > { %v457_v31 = vpop.permute.xlu1 %456  ;;  %v455_v62 = vpop.permute.xlu0 %454 }
 0x19e   : > { %v473_v63 = vadd.f32 %v457_v31, %v425_v29  ;;  %v472_v52 = vadd.f32 %v455_v62, %v424_v51 }
 0x1a1   : > { %v493_v10 = vpop.permute.xlu1 %492  ;;  %v491_v53 = vpop.permute.xlu0 %490 }
 0x1a2   : > { %v515_v12 = vadd.f32 %v493_v10, %v467_v37  ;;  %v514_v38 = vadd.f32 %v491_v53, %v466_v61 }
 0x1a5   : > { %v497_v13 = vpop.permute.xlu1 %496  ;;  %v495_v39 = vpop.permute.xlu0 %494 }
 0x1a6   : > { %v517_v3 = vadd.f32 %v497_v13, %v469_v26  ;;  %v516_v1 = vadd.f32 %v495_v39, %v468_v9 }
 0x1a9   : > { %v501_v19 = vpop.permute.xlu1 %500  ;;  %v499_v46 = vpop.permute.xlu0 %498 }
 0x1aa   : > { %v519_v20 = vadd.f32 %v501_v19, %v471_v7  ;;  %v518_v21 = vadd.f32 %v499_v46, %v470_v30 }
 0x1ad   : > { %v505_v24 = vpop.permute.xlu1 %504  ;;  %v503_v2 = vpop.permute.xlu0 %502 }
 0x1ae   : > { %v521_v0 = vadd.f32 %v505_v24, %v473_v63  ;;  %v520_v8 = vadd.f32 %v503_v2, %v472_v52 }
 0x1b1   : > { %v541_v18 = vpop.permute.xlu1 %540  ;;  %v539_v25 = vpop.permute.xlu0 %538 }
 0x1b2   : > { %v563_v32 = vadd.f32 %v541_v18, %v515_v12  ;;  %v562_v4 = vadd.f32 %v539_v25, %v514_v38 }
 0x1b5   : > { %v545_v5 = vpop.permute.xlu1 %544  ;;  %v543_v33 = vpop.permute.xlu0 %542 }
 0x1b6   : > { %v565_v40 = vadd.f32 %v545_v5, %v517_v3  ;;  %v564_v41 = vadd.f32 %v543_v33, %v516_v1 }
 0x1b9   : > { %v549_v14 = vpop.permute.xlu1 %548  ;;  %v547_v22 = vpop.permute.xlu0 %546 }
 0x1ba   : > { %v567_v15 = vadd.f32 %v549_v14, %v519_v20  ;;  %v566_v27 = vadd.f32 %v547_v22, %v518_v21 }
 0x1bd   : > { %v553_v47 = vpop.permute.xlu1 %552  ;;  %v551_v35 = vpop.permute.xlu0 %550 }
 0x1be   : > { %v569_v49 = vadd.f32 %v553_v47, %v521_v0  ;;  %v568_v54 = vadd.f32 %v551_v35, %v520_v8 }
 0x1c1   : > { %v589_v55 = vpop.permute.xlu1 %588  ;;  %v587_v42 = vpop.permute.xlu0 %586 }
 0x1c2   : > { %v611_v10 = vadd.f32 %v589_v55, %v563_v32  ;;  %v610_v53 = vadd.f32 %v587_v42, %v562_v4 }
 0x1c5   : > { %v593_v43 = vpop.permute.xlu1 %592  ;;  %v591_v56 = vpop.permute.xlu0 %590 }
 0x1c6   : > { %v613_v13 = vadd.f32 %v593_v43, %v565_v40  ;;  %v612_v1 = vadd.f32 %v591_v56, %v564_v41 }
 0x1c9   : > { %v597_v57 = vpop.permute.xlu1 %596  ;;  %v595_v6 = vpop.permute.xlu0 %594 }
 0x1ca   : > { %v615_v19 = vadd.f32 %v597_v57, %v567_v15  ;;  %v614_v21 = vadd.f32 %v595_v6, %v566_v27 }
 0x1cd   : > { %v601_v28 = vpop.permute.xlu1 %600  ;;  %v599_v50 = vpop.permute.xlu0 %598 }
 0x1ce   : > { %v617_v58 = vadd.f32 %v601_v28, %v569_v49  ;;  %v616_v59 = vadd.f32 %v599_v50, %v568_v54 }
 0x1d1   : > { %v621_v48 = vpop.permute.xlu1 %620  ;;  %v619_v34 = vpop.permute.xlu0 %618 }
 0x1d2   : > { %v643_v12 = vadd.f32 %v621_v48, %v611_v10  ;;  %v642_v38 = vadd.f32 %v619_v34, %v610_v53 }
 0x1d5   : > { %v625_v60 = vpop.permute.xlu1 %624  ;;  %v623_v36 = vpop.permute.xlu0 %622 }
 0x1d6   : > { %v645_v24 = vadd.f32 %v625_v60, %v613_v13  ;;  %v644_v2 = vadd.f32 %v623_v36, %v612_v1 }
 0x1d9   : > { %v629_v37 = vpop.permute.xlu1 %628  ;;  %v627_v61 = vpop.permute.xlu0 %626 }
 0x1da   : > { %v647_v0 = vadd.f32 %v629_v37, %v615_v19  ;;  %v646_v25 = vadd.f32 %v627_v61, %v614_v21 }
 0x1dd   : > { %v633_v11 = vpop.permute.xlu1 %632  ;;  %v631_v44 = vpop.permute.xlu0 %630 }
 0x1de   : > { %v649_v5 = vadd.f32 %v633_v11, %v617_v58  ;;  %v648_v32 = vadd.f32 %v631_v44, %v616_v59 }
 0x1e1   : > { %v653_v45 = vpop.permute.xlu1 %652  ;;  %v651_v23 = vpop.permute.xlu0 %650 }
 0x1e2   : > { %v675_v46 = vadd.f32 %v653_v45, %v643_v12  ;;  %v674_v20 = vadd.f32 %v651_v23, %v642_v38 }
 0x1e5   : > { %v657_v26 = vpop.permute.xlu1 %656  ;;  %v655_v9 = vpop.permute.xlu0 %654 }
 0x1e6   : > { %v677_v4 = vadd.f32 %v657_v26, %v645_v24  ;;  %v676_v14 = vadd.f32 %v655_v9, %v644_v2 }
 0x1e9   : > { %v661_v16 = vpop.permute.xlu1 %660  ;;  %v659_v17 = vpop.permute.xlu0 %658 }
 0x1ea   : > { %v679_v41 = vadd.f32 %v661_v16, %v647_v0  ;;  %v678_v47 = vadd.f32 %v659_v17, %v646_v25 }
 0x1ed   : > { %v665_v29 = vpop.permute.xlu1 %664  ;;  %v663_v51 = vpop.permute.xlu0 %662 }
 0x1ee   : > { %v681_v27 = vadd.f32 %v665_v29, %v649_v5  ;;  %v680_v35 = vadd.f32 %v663_v51, %v648_v32 }
 0x1f1   : > { %v685_v7 = vpop.permute.xlu1 %684  ;;  %v683_v30 = vpop.permute.xlu0 %682 }
 0x1f2   : > { %v707_v8 = vadd.f32 %v685_v7, %v675_v46  ;;  %v706_v18 = vadd.f32 %v683_v30, %v674_v20 }
 0x1f5   : > { %v689_v31 = vpop.permute.xlu1 %688  ;;  %v687_v62 = vpop.permute.xlu0 %686 }
 0x1f6   : > { %v709_v49 = vadd.f32 %v689_v31, %v677_v4  ;;  %v708_v56 = vadd.f32 %v687_v62, %v676_v14 }
 0x1f9   : > { %v693_v63 = vpop.permute.xlu1 %692  ;;  %v691_v52 = vpop.permute.xlu0 %690 }
 0x1fa   : > { %v711_v57 = vadd.f32 %v693_v63, %v679_v41  ;;  %v710_v6 = vadd.f32 %v691_v52, %v678_v47 }
 0x1fd   : > { %v697_v39 = vpop.permute.xlu1 %696  ;;  %v695_v3 = vpop.permute.xlu0 %694 }
 0x1fe   : > { %v1733_v28 = vadd.f32 %v697_v39, %v681_v27  ;;  %v712_v44 = vadd.f32 %v695_v3, %v680_v35 }
 0x201   : > { %v725_v33 = vpop.permute.xlu1 %724  ;;  %v723_v40 = vpop.permute.xlu0 %722 }
 0x202   : > { %v747_v22 = vadd.f32 %v725_v33, %v707_v8  ;;  %v746_v15 = vadd.f32 %v723_v40, %v706_v18 }
 0x204   : > { %v772_v54 = vrot.slane %v747_v22, 7  ;;  %v795_v55 = vrot.slane %v747_v22, 5  ;;  %v758_v42 = vrot.slane %v746_v15, 1  ;;  %v771_v43 = vrot.slane %v746_v15, 7 }
 0x205   : > { %v729_v50 = vpop.permute.xlu1 %728  ;;  %v727_v58 = vpop.permute.xlu0 %726 }
 0x206   : > { %v807_v59 = vsel %vm770_vm8, %v772_v54, %v795_v55  ;;  %v773_v48 = vsel %vm770_vm8, %v771_v43, %v772_v54  ;;  %v803_v34 = vsel %vm770_vm8, %v758_v42, %v771_v43  ;;  %v749_v60 = vadd.f32 %v729_v50, %v709_v49 }
 0x207   : > { %v821_v36 = vmul.f32 0.99761444, %v807_v59  ;;  %v880_v37 = vmul.f32 0.0011927794, %v807_v59  ;;  %v811_v61 = vmul.f32 0.0011927794, %v803_v34  ;;  %v748_v11 = vadd.f32 %v727_v58, %v708_v56 }
 0x208   : > { %v812_v45 = vmul.f32 0.0011927794, %v773_v48  ;;  %v819_v23 = vmul.f32 0.99761444, %v803_v34  ;;  %v820_v26 = vmul.f32 0.99761444, %v773_v48 }
 0x209   : > { %v847_v9 = vrot.slane %v821_v36, 1  ;;  %v900_v16 = vrot.slane %v880_v37, 2  ;;  %v897_v17 = vrot.slane %v811_v61, 2  ;;  %v775_v29 = vrot.slane %v749_v60, 7  ;;  %v733_v51 = vpop.permute.xlu1 %732  ;;  %v731_v7 = vpop.permute.xlu0 %730 }
 0x20a   : > { %v844_v30 = vrot.slane %v819_v23, 1  ;;  %v845_v31 = vrot.slane %v820_v26, 1  ;;  %v898_v62 = vrot.slane %v812_v45, 2  ;;  %v796_v63 = vrot.slane %v749_v60, 5 }
 0x20b   : > { %v759_v52 = vrot.slane %v748_v11, 1  ;;  %v774_v10 = vrot.slane %v748_v11, 7  ;;  %v751_v53 = vadd.f32 %v733_v51, %v711_v57  ;;  %v750_v12 = vadd.f32 %v731_v7, %v710_v6 }
 0x20c   : > { %v846_v38 = vsel %vm843_vm9, %v844_v30, %v845_v31  ;;  %v848_v13 = vsel %vm843_vm9, %v845_v31, %v847_v9  ;;  %v899_v39 = vsel %vm896_vm10, %v897_v17, %v898_v62  ;;  %v901_v3 = vsel %vm896_vm10, %v898_v62, %v900_v16 }
 0x20d   : > { %v872_v1 = vadd.f32 %v846_v38, %v811_v61  ;;  %v873_v19 = vadd.f32 %v848_v13, %v812_v45  ;;  %v808_v46 = vsel %vm770_vm8, %v775_v29, %v796_v63  ;;  %v776_v20 = vsel %vm770_vm8, %v774_v10, %v775_v29  ;;  %v737_v14 = vpop.permute.xlu1 %736  ;;  %v735_v41 = vpop.permute.xlu0 %734 }
 0x20e   : > { %v824_v21 = vmul.f32 0.99761444, %v808_v46  ;;  %v881_v24 = vmul.f32 0.0011927794, %v808_v46  ;;  %v804_v2 = vsel %vm770_vm8, %v759_v52, %v774_v10  ;;  %v814_v0 = vmul.f32 0.0011927794, %v776_v20 }
 0x20f   : > { %v925_v8 = vadd.f32 %v899_v39, %v872_v1  ;;  %v926_v18 = vadd.f32 %v901_v3, %v873_v19  ;;  %v813_v25 = vmul.f32 0.0011927794, %v804_v2  ;;  %v822_v5 = vmul.f32 0.99761444, %v804_v2 }
 0x210   : > { %v852_v32 = vrot.slane %v824_v21, 1  ;;  %v905_v4 = vrot.slane %v881_v24, 2  ;;  %v823_v33 = vmul.f32 0.99761444, %v776_v20  ;;  %v903_v40 = vrot.slane %v814_v0, 2 }
 0x211   : > { %934 = vst.msk [vmem:[%s1747_s21] sm:$0xff] %vm933_vm11, %v925_v8  ;;  %935 = vst.msk [vmem:[%s1747_s21 + $0x8] sm:$0xff] %vm933_vm11, %v926_v18  ;;  %v849_v22 = vrot.slane %v822_v5, 1  ;;  %v902_v15 = vrot.slane %v813_v25, 2  ;;  %v778_v47 = vrot.slane %v751_v53, 7  ;;  %v797_v27 = vrot.slane %v751_v53, 5 }
 0x212   : > { %v850_v35 = vrot.slane %v823_v33, 1  ;;  %v906_v49 = vsel %vm896_vm10, %v903_v40, %v905_v4  ;;  %v760_v54 = vrot.slane %v750_v12, 1  ;;  %v777_v55 = vrot.slane %v750_v12, 7 }
 0x213   : > { %v904_v42 = vsel %vm896_vm10, %v902_v15, %v903_v40  ;;  %v809_v43 = vsel %vm770_vm8, %v778_v47, %v797_v27  ;;  %v753_v56 = vadd.f32 %v737_v14, %v1733_v28  ;;  %v752_v57 = vadd.f32 %v735_v41, %v712_v44 }
 0x214   : > { %v851_v6 = vsel %vm843_vm9, %v849_v22, %v850_v35  ;;  %v853_v50 = vsel %vm843_vm9, %v850_v35, %v852_v32  ;;  %v827_v58 = vmul.f32 0.99761444, %v809_v43  ;;  %v882_v59 = vmul.f32 0.0011927794, %v809_v43 }
 0x215   : > { %v874_v48 = vadd.f32 %v851_v6, %v813_v25  ;;  %v875_v34 = vadd.f32 %v853_v50, %v814_v0  ;;  %v779_v60 = vsel %vm770_vm8, %v777_v55, %v778_v47  ;;  %v805_v36 = vsel %vm770_vm8, %v760_v54, %v777_v55 }
 0x216   : > { %v857_v37 = vrot.slane %v827_v58, 1  ;;  %v910_v61 = vrot.slane %v882_v59, 2  ;;  %v815_v11 = vmul.f32 0.0011927794, %v805_v36  ;;  %v816_v45 = vmul.f32 0.0011927794, %v779_v60 }
 0x217   : > { %v927_v28 = vadd.f32 %v904_v42, %v874_v48  ;;  %v928_v44 = vadd.f32 %v906_v49, %v875_v34  ;;  %v825_v23 = vmul.f32 0.99761444, %v805_v36  ;;  %v826_v26 = vmul.f32 0.99761444, %v779_v60 }
 0x218   : > { %v907_v9 = vrot.slane %v815_v11, 2  ;;  %v908_v16 = vrot.slane %v816_v45, 2  ;;  %v781_v17 = vrot.slane %v753_v56, 7  ;;  %v798_v29 = vrot.slane %v753_v56, 5 }
 0x219   : > { %936 = vst.msk [vmem:[%s1747_s21 + $0x10] sm:$0xff] %vm933_vm11, %v927_v28  ;;  %937 = vst.msk [vmem:[%s1747_s21 + $0x18] sm:$0xff] %vm933_vm11, %v928_v44  ;;  %v854_v51 = vrot.slane %v825_v23, 1  ;;  %v855_v7 = vrot.slane %v826_v26, 1  ;;  %v761_v30 = vrot.slane %v752_v57, 1  ;;  %v780_v31 = vrot.slane %v752_v57, 7 }
 0x21a   : > { %v909_v62 = vsel %vm896_vm10, %v907_v9, %v908_v16  ;;  %v911_v63 = vsel %vm896_vm10, %v908_v16, %v910_v61  ;;  %v810_v52 = vsel %vm770_vm8, %v781_v17, %v798_v29 }
 0x21b   : > { %v856_v10 = vsel %vm843_vm9, %v854_v51, %v855_v7  ;;  %v858_v53 = vsel %vm843_vm9, %v855_v7, %v857_v37  ;;  %v830_v12 = vmul.f32 0.99761444, %v810_v52  ;;  %v883_v38 = vmul.f32 0.0011927794, %v810_v52 }
 0x21c   : > { %v876_v13 = vadd.f32 %v856_v10, %v815_v11  ;;  %v877_v39 = vadd.f32 %v858_v53, %v816_v45  ;;  %v782_v3 = vsel %vm770_vm8, %v780_v31, %v781_v17  ;;  %v806_v1 = vsel %vm770_vm8, %v761_v30, %v780_v31 }
 0x21d   : > { %v862_v19 = vrot.slane %v830_v12, 1  ;;  %v915_v46 = vrot.slane %v883_v38, 2  ;;  %v817_v20 = vmul.f32 0.0011927794, %v806_v1  ;;  %v818_v21 = vmul.f32 0.0011927794, %v782_v3 }
 0x21e   : > { %v929_v24 = vadd.f32 %v909_v62, %v876_v13  ;;  %v930_v2 = vadd.f32 %v911_v63, %v877_v39  ;;  %v828_v0 = vmul.f32 0.99761444, %v806_v1  ;;  %v829_v8 = vmul.f32 0.99761444, %v782_v3 }
 0x21f   : > { %v912_v18 = vrot.slane %v817_v20, 2  ;;  %v913_v25 = vrot.slane %v818_v21, 2 }
 0x220   : > { %938 = vst.msk [vmem:[%s1747_s21 + $0x20] sm:$0xff] %vm933_vm11, %v929_v24  ;;  %939 = vst.msk [vmem:[%s1747_s21 + $0x28] sm:$0xff] %vm933_vm11, %v930_v2  ;;  %v859_v5 = vrot.slane %v828_v0, 1  ;;  %v860_v32 = vrot.slane %v829_v8, 1 }
 0x221   : > { %v914_v4 = vsel %vm896_vm10, %v912_v18, %v913_v25  ;;  %v916_v33 = vsel %vm896_vm10, %v913_v25, %v915_v46 }
 0x222   : > { %v861_v40 = vsel %vm843_vm9, %v859_v5, %v860_v32  ;;  %v863_v14 = vsel %vm843_vm9, %v860_v32, %v862_v19 }
 0x223   : > { %v878_v41 = vadd.f32 %v861_v40, %v817_v20  ;;  %v879_v22 = vadd.f32 %v863_v14, %v818_v21 }
 0x225   : > { %v931_v15 = vadd.f32 %v914_v4, %v878_v41  ;;  %v932_v47 = vadd.f32 %v916_v33, %v879_v22 }
 0x227   : > { %940 = vst.msk [vmem:[%s1747_s21 + $0x30] sm:$0xff] %vm933_vm11, %v931_v15  ;;  %941 = vst.msk [vmem:[%s1747_s21 + $0x38] sm:$0xff] %vm933_vm11, %v932_v47 }
 0x228   : > { %1154 = shalt.err (!%p1151_p10)
}
 0x229   : > { %s1155_s3 = scalar_lea.hbm %s1785_s25, 1024  ;;  %s1159_s11 = scalar_lea.hbm %s1836_s1, 2048 }
 0x22a   : > { %p1156_p0 = scmp.ne.s32.totalorder %s1785_s25, %s1155_s3  ;;  %p1160_p1 = scmp.lt.s32.totalorder %s1785_s25, %s1836_s1 }
 0x22b   : > { %p1161_p3 = scmp.lt.s32.totalorder %s1159_s11, %s1155_s3 }
 0x22c   : > { %p1157_p2 = pnand %p1156_p0, %p1851_p12 }
 0x22d   : > { %p1162_p6 = por %p1161_p3, %p1160_p1 }
 0x22e   : > { %p1158_p9 = pneg %p1157_p2 }
 0x230   : > { %p1163_p11 = pnand %p1162_p6, %p1158_p9 }
 0x232   : > { %1166 = shalt.err (!%p1163_p11)
}
 0x233   : > { %s1225_s16 = smov 128  }
 0x234   : > { %1052 = dma.vmem_to_hbm [thread:$0]  (%p1851_p12), %s1787_s24, 1024, %s1785_s25, %s943_s10, %s1225_s16, %s1225_s16, %s1215_s2  }
 0x235 PF: > { %s972_s20 = sand.u32 1, %s1193_s6   ;;  %p1852_p13 = scmp.ne.s32.totalorder %s1842_s19, 0 }
 0x236   : > { %p1853_p4 = scmp.ge.s32.totalorder %s1205_s9, 2  ;;  %s973_s21 = scalar_lea.sflag [#allocation4], %s972_s20 }
 0x238   : > { %p1059_p5 = pnand %p1853_p4, %p1852_p13 }
 0x23a   : > { %p1060_p7 = pneg %p1059_p5 }
 0x23c   : > { %1188 = dma.done.wait (%p1060_p7), %s973_s21, 1024  }
 0x23d   : > { %1190 = vsyncadd (%p1060_p7), %s973_s21, 4294966272  ;;  %p14_p8 = scmp.ge.s32.totalorder %s1261_s12, 4   ;;  %s1854_s6 = smov %s1197_s7 }
 0x23e   : > { %s1855_s7 = smov %s1201_s8  ;;  %s1856_s8 = smov %s1273_s15 }
 0x23f   : > { %s1857_s9 = smov %s1261_s12  ;;  %16 = sbr.rel (!%p14_p8) target bundleno = 5 (0x5), region = 69 }
 0x244   :  { %978 = vsyncpa [#allocation3], 1 }
 0x245   :  { %980 = vsyncpa [#allocation3 + $0x1], 1 }
 0x246   :  { %981 = vsyncpa [#allocation4], 1 }
 0x247   :  { %983 = vsyncpa [#allocation4 + $0x1], 1 }

</bundles_post_ra>
